<compile_context>
chip_gen: v6e
topology: v6e:2x2x1
jax: 0.10.0
libtpu: 0.0.40
codegen_flags: <defaults>
</compile_context>

<pallas_src>
import jax
import jax.numpy as jnp
from jax import lax
from jax.experimental import pallas as pl
from jax.experimental.pallas import tpu as pltpu


def _fast_focal_kernel(out_ref, tgt_ref, ind_ref, cat_ref, mask_ref,
                       res_ref, neg_acc, p_acc):
    # out_ref/tgt_ref: (1, C, T) native dtype ; ind_ref/cat_ref: (1, 1, M) i32
    # mask_ref: (1, 1, M) f32 ; res_ref: (1, 1, 128) f32
    # neg_acc: (1, T) f32 scratch ; p_acc: (1, M) f32 scratch
    t = pl.program_id(1)
    n_t = pl.num_programs(1)

    @pl.when(t == 0)
    def _init():
        neg_acc[...] = jnp.zeros_like(neg_acc)
        p_acc[...] = jnp.zeros_like(p_acc)

    o_nat = out_ref[0]                         # (C, T) native dtype
    o = o_nat.astype(jnp.float32)              # (C, T) f32 for VPU/EUP math
    tgt = tgt_ref[0].astype(jnp.float32)       # (C, T)
    C, T = o.shape

    # ---- negative loss partial: log(1 - out) * out^2 * (1 - target)^4 ----
    one_m_t = 1.0 - tgt
    gt2 = one_m_t * one_m_t
    gt4 = gt2 * gt2                                        # (1 - target)^4
    # kept as log(1 - out) verbatim for exact parity with the torch module.
    neg = jnp.log(1.0 - o) * (o * o) * gt4                 # (C, T)
    # sublane reduce only; defer the cross-lane (XLU) reduce to the last tile.
    neg_acc[...] += jnp.sum(neg, axis=0, keepdims=True)    # (1, T)

    # ---- positive gather partial: range-masked one-hot within this tile ----
    ind_v = ind_ref[0]                        # (1, M) flat spatial index
    cat_v = cat_ref[0]                        # (1, M) category id
    M = ind_v.shape[1]
    local = ind_v - t * T                     # peak position inside this tile
    hw_iota = lax.broadcasted_iota(jnp.int32, (T, M), 0)
    # all-zero column if the peak does not live in this tile.
    sel_hw = (hw_iota == local).astype(o_nat.dtype)        # (T, M)
    # MXU contraction over T (long, 128-multiple axis) in the native dtype.
    gathered = jnp.dot(o_nat, sel_hw,
                       preferred_element_type=jnp.float32)  # (C, M) f32
    c_iota = lax.broadcasted_iota(jnp.int32, (C, M), 0)
    sel_c = (c_iota == cat_v).astype(jnp.float32)           # (C, M)
    p_acc[...] += jnp.sum(gathered * sel_c, axis=0, keepdims=True)  # (1, M)

    # ---- finalize once per batch on the last spatial tile ----
    @pl.when(t == n_t - 1)
    def _fin():
        msk = mask_ref[0].astype(jnp.float32)              # (1, M)
        p = p_acc[...]
        # masked-out / padded peaks may have gathered 0; keep log() finite
        # there -- the mask zeroes the term exactly as in the PyTorch code.
        p_safe = jnp.where(msk > 0.0, p, 0.5)
        one_m_p = 1.0 - p_safe
        pos_loss = jnp.sum(jnp.log(p_safe) * (one_m_p * one_m_p) * msk)
        neg_loss = jnp.sum(neg_acc[...])
        num_pos = jnp.sum(msk)
        lane = lax.broadcasted_iota(jnp.int32, (1, 128), 1)
        row = (jnp.where(lane == 0, neg_loss, 0.0) +
               jnp.where(lane == 1, pos_loss, 0.0) +
               jnp.where(lane == 2, num_pos, 0.0))          # (1, 128)
        res_ref[0] = row


def _round_up(x, m):
    return (x + m - 1) // m * m


def fast_focal_loss(out, target, ind, mask, cat, *, max_tile_hw=1024):
    """Matches FastFocalLoss.forward(out, target, ind, mask, cat).

    `out` / `target` may be f32 or bf16; they are streamed in their native
    dtype (bf16 halves HBM traffic) and upcast to f32 per tile in the kernel.
    """
    assert max_tile_hw % 128 == 0, "max_tile_hw must be a multiple of 128"
    B, C, H, W = out.shape
    M = ind.shape[1]
    HW = H * W

    # spatial tile: whole (128-padded) heatmap if small, else max_tile_hw.
    # 2 heatmap arrays x 2 pipeline buffers x (C, tile) stays comfortably
    # inside scoped VMEM on v5e / v6e / v7x even for C ~ 80.
    hw128 = _round_up(HW, 128)
    tile = hw128 if hw128 <= max_tile_hw else max_tile_hw
    hw_pad = _round_up(HW, tile)
    n_t = hw_pad // tile

    out2 = out.reshape(B, C, HW)          # keep native dtype
    tgt2 = target.reshape(B, C, HW)
    if hw_pad != HW:
        pad = ((0, 0), (0, 0), (0, hw_pad - HW))
        out2 = jnp.pad(out2, pad)         # out = 0 -> zero neg contribution
        tgt2 = jnp.pad(tgt2, pad)
    ind3 = ind.reshape(B, 1, M).astype(jnp.int32)
    cat3 = cat.reshape(B, 1, M).astype(jnp.int32)
    mask3 = mask.reshape(B, 1, M).astype(jnp.float32)

    res = pl.pallas_call(
        _fast_focal_kernel,
        out_shape=jax.ShapeDtypeStruct((B, 1, 128), jnp.float32),
        grid_spec=pltpu.PrefetchScalarGridSpec(
            num_scalar_prefetch=0,
            grid=(B, n_t),
            in_specs=[
                pl.BlockSpec((1, C, tile), lambda b, t: (b, 0, t)),
                pl.BlockSpec((1, C, tile), lambda b, t: (b, 0, t)),
                # same block across all spatial tiles -> one DMA per batch.
                pl.BlockSpec((1, 1, M), lambda b, t: (b, 0, 0)),
                pl.BlockSpec((1, 1, M), lambda b, t: (b, 0, 0)),
                pl.BlockSpec((1, 1, M), lambda b, t: (b, 0, 0)),
            ],
            out_specs=pl.BlockSpec((1, 1, 128), lambda b, t: (b, 0, 0)),
            scratch_shapes=[
                pltpu.VMEM((1, tile), jnp.float32),   # neg partial (lane vec)
                pltpu.VMEM((1, M), jnp.float32),      # gathered peak values
            ],
        ),
        compiler_params=pltpu.CompilerParams(
            dimension_semantics=("parallel", "arbitrary"),
            vmem_limit_bytes=32 * 1024 * 1024,
        ),
    )(out2, tgt2, ind3, cat3, mask3)

    neg_loss = jnp.sum(res[:, 0, 0])
    pos_loss = jnp.sum(res[:, 0, 1])
    num_pos = jnp.sum(res[:, 0, 2])
    # `if num_pos == 0: return -neg_loss` branch, done branchlessly in glue.
    denom = jnp.where(num_pos == 0, 1.0, num_pos)
    return jnp.where(num_pos == 0, -neg_loss, -(pos_loss + neg_loss) / denom)


def _reference_loss(out, target, ind, mask, cat):
    """Pure-JAX reference mirroring the PyTorch forward."""
    B, C, H, W = out.shape
    gt = jnp.power(1.0 - target, 4)
    neg_loss = jnp.sum(jnp.log(1.0 - out) * jnp.power(out, 2) * gt)
    o_flat = out.reshape(B, C, H * W)
    b_idx = jnp.arange(B)[:, None]
    pos_pred = o_flat[b_idx, cat, ind]                       # (B, M)
    mask_f = mask.astype(jnp.float32)
    pos_loss = jnp.sum(jnp.log(pos_pred) * jnp.power(1.0 - pos_pred, 2) * mask_f)
    num_pos = jnp.sum(mask_f)
    denom = jnp.where(num_pos == 0, 1.0, num_pos)
    return jnp.where(num_pos == 0, -neg_loss, -(pos_loss + neg_loss) / denom)


if __name__ == "__main__":
    B, C, H, W, M = 2, 4, 16, 16, 8
    key = jax.random.PRNGKey(0)
    k_out, k_tgt, k_ind, k_cat, k_msk = jax.random.split(key, 5)

    # predicted heatmap in (0, 1) (post-sigmoid), clipped away from the edges
    out = jax.nn.sigmoid(jax.random.normal(k_out, (B, C, H, W), jnp.float32))
    out = jnp.clip(out, 1e-4, 1.0 - 1e-4)
    # target heatmap in [0, 0.95]
    target = jax.random.uniform(k_tgt, (B, C, H, W), jnp.float32, 0.0, 0.95)
    ind = jax.random.randint(k_ind, (B, M), 0, H * W, jnp.int32)
    cat = jax.random.randint(k_cat, (B, M), 0, C, jnp.int32)
    mask = (jax.random.uniform(k_msk, (B, M)) > 0.3).astype(jnp.float32)

    ref = jax.block_until_ready(_reference_loss(out, target, ind, mask, cat))

    # single-tile path (HW fits in one 128-padded tile)
    loss = jax.block_until_ready(fast_focal_loss(out, target, ind, mask, cat))
    assert jnp.isfinite(loss), f"non-finite loss: {loss}"
    assert jnp.allclose(loss, ref, rtol=1e-4, atol=1e-4), (loss, ref)

    # multi-tile path (force 2 spatial tiles to exercise the accumulators)
    loss_t = jax.block_until_ready(
        fast_focal_loss(out, target, ind, mask, cat, max_tile_hw=128))
    assert jnp.isfinite(loss_t), f"non-finite tiled loss: {loss_t}"
    assert jnp.allclose(loss_t, ref, rtol=1e-4, atol=1e-4), (loss_t, ref)

    # num_pos == 0 branch (also checks the log(0) NaN guard for masked peaks)
    zero_mask = jnp.zeros_like(mask)
    loss0 = jax.block_until_ready(
        fast_focal_loss(out, target, ind, zero_mask, cat))
    ref0 = jax.block_until_ready(
        _reference_loss(out, target, ind, zero_mask, cat))
    assert jnp.isfinite(loss0), f"non-finite zero-pos loss: {loss0}"
    assert jnp.allclose(loss0, ref0, rtol=1e-4, atol=1e-4), (loss0, ref0)

    # bf16 heatmaps exercise the native-dtype MXU gather / halved HBM path
    loss_bf = jax.block_until_ready(
        fast_focal_loss(out.astype(jnp.bfloat16), target.astype(jnp.bfloat16),
                        ind, mask, cat))
    ref_bf = jax.block_until_ready(
        _reference_loss(out.astype(jnp.bfloat16).astype(jnp.float32),
                        target.astype(jnp.bfloat16).astype(jnp.float32),
                        ind, mask, cat))
    assert jnp.isfinite(loss_bf), f"non-finite bf16 loss: {loss_bf}"
    assert jnp.allclose(loss_bf, ref_bf, rtol=2e-2, atol=2e-2), (loss_bf, ref_bf)

    print("KERNEL_OK")
</pallas_src>

<mosaic_0001>
module attributes {stable_mosaic.version = 11 : i64} {
  func.func @_fast_focal_kernel(%arg0: i32, %arg1: i32, %arg2: memref<1x4x256xf32, #tpu.memory_space<vmem>>, %arg3: memref<1x4x256xf32, #tpu.memory_space<vmem>>, %arg4: memref<1x1x8xi32, #tpu.memory_space<vmem>>, %arg5: memref<1x1x8xi32, #tpu.memory_space<vmem>>, %arg6: memref<1x1x8xf32, #tpu.memory_space<vmem>>, %arg7: memref<1x1x128xf32, #tpu.memory_space<vmem>>, %arg8: memref<1x256xf32, #tpu.memory_space<vmem>>, %arg9: memref<1x8xf32, #tpu.memory_space<vmem>>) attributes {dimension_semantics = [#tpu.dimension_semantics<parallel>, #tpu.dimension_semantics<arbitrary>], iteration_bounds = array<i64: 2, 1>, scalar_prefetch = 0 : i64, scratch_operands = 2 : i64, tpu.core_type = #tpu.core_type<tc>, window_params = [{transform_indices = @transform_0, window_bounds = array<i64: 1, 4, 256>}, {transform_indices = @transform_1, window_bounds = array<i64: 1, 4, 256>}, {transform_indices = @transform_2, window_bounds = array<i64: 1, 1, 8>}, {transform_indices = @transform_3, window_bounds = array<i64: 1, 1, 8>}, {transform_indices = @transform_4, window_bounds = array<i64: 1, 1, 8>}, {transform_indices = @transform_5, window_bounds = array<i64: 1, 1, 128>}]} {
    %c0_i32 = arith.constant 0 : i32
    %0 = arith.cmpi eq, %arg1, %c0_i32 : i32
    %1 = arith.extui %0 : i1 to i32
    %c0_i32_0 = arith.constant 0 : i32
    %2 = arith.cmpi ne, %1, %c0_i32_0 : i32
    scf.if %2 {
      %cst_26 = arith.constant 0.000000e+00 : f32
      %49 = vector.broadcast %cst_26 : f32 to vector<1x256xf32>
      %c0_27 = arith.constant 0 : index
      %c0_28 = arith.constant 0 : index
      %50 = vector.load %arg8[%c0_27, %c0_28] : memref<1x256xf32, #tpu.memory_space<vmem>>, vector<1x256xf32>
      tpu.vector_store %arg8[%c0_27, %c0_28], %49 {strides = array<i32>} : memref<1x256xf32, #tpu.memory_space<vmem>>, vector<1x256xf32>,
      %cst_29 = arith.constant 0.000000e+00 : f32
      %51 = vector.broadcast %cst_29 : f32 to vector<1x8xf32>
      %c0_30 = arith.constant 0 : index
      %c0_31 = arith.constant 0 : index
      %52 = vector.load %arg9[%c0_30, %c0_31] : memref<1x8xf32, #tpu.memory_space<vmem>>, vector<1x8xf32>
      tpu.vector_store %arg9[%c0_30, %c0_31], %51 {strides = array<i32>} : memref<1x8xf32, #tpu.memory_space<vmem>>, vector<1x8xf32>,
    } else {
    }
    %c0 = arith.constant 0 : index
    %c0_1 = arith.constant 0 : index
    %c0_2 = arith.constant 0 : index
    %3 = vector.load %arg2[%c0, %c0_1, %c0_2] : memref<1x4x256xf32, #tpu.memory_space<vmem>>, vector<1x4x256xf32>
    %4 = vector.shape_cast %3 : vector<1x4x256xf32> to vector<4x256xf32>
    %c0_3 = arith.constant 0 : index
    %c0_4 = arith.constant 0 : index
    %c0_5 = arith.constant 0 : index
    %5 = vector.load %arg3[%c0_3, %c0_4, %c0_5] : memref<1x4x256xf32, #tpu.memory_space<vmem>>, vector<1x4x256xf32>
    %6 = vector.shape_cast %5 : vector<1x4x256xf32> to vector<4x256xf32>
    %cst = arith.constant 1.000000e+00 : f32
    %7 = vector.broadcast %cst : f32 to vector<4x256xf32>
    %8 = arith.subf %7, %6 : vector<4x256xf32>
    %9 = arith.mulf %8, %8 : vector<4x256xf32>
    %10 = arith.mulf %9, %9 : vector<4x256xf32>
    %cst_6 = arith.constant 1.000000e+00 : f32
    %11 = vector.broadcast %cst_6 : f32 to vector<4x256xf32>
    %12 = arith.subf %11, %4 : vector<4x256xf32>
    %13 = math.log %12 : vector<4x256xf32>
    %14 = arith.mulf %4, %4 : vector<4x256xf32>
    %15 = arith.mulf %13, %14 : vector<4x256xf32>
    %16 = arith.mulf %15, %10 : vector<4x256xf32>
    %c0_7 = arith.constant 0 : index
    %c0_8 = arith.constant 0 : index
    %17 = vector.load %arg8[%c0_7, %c0_8] : memref<1x256xf32, #tpu.memory_space<vmem>>, vector<1x256xf32>
    %cst_9 = arith.constant dense<0.000000e+00> : vector<256xf32>
    %18 = vector.multi_reduction <add>, %16, %cst_9 [0] : vector<4x256xf32> to vector<256xf32>
    %19 = vector.shape_cast %18 : vector<256xf32> to vector<1x256xf32>
    %20 = arith.addf %17, %19 : vector<1x256xf32>
    %c0_10 = arith.constant 0 : index
    %c0_11 = arith.constant 0 : index
    %21 = vector.load %arg8[%c0_10, %c0_11] : memref<1x256xf32, #tpu.memory_space<vmem>>, vector<1x256xf32>
    tpu.vector_store %arg8[%c0_10, %c0_11], %20 {strides = array<i32>} : memref<1x256xf32, #tpu.memory_space<vmem>>, vector<1x256xf32>,
    %c0_12 = arith.constant 0 : index
    %c0_13 = arith.constant 0 : index
    %c0_14 = arith.constant 0 : index
    %22 = vector.load %arg4[%c0_12, %c0_13, %c0_14] : memref<1x1x8xi32, #tpu.memory_space<vmem>>, vector<1x1x8xi32>
    %23 = vector.shape_cast %22 : vector<1x1x8xi32> to vector<1x8xi32>
    %c0_15 = arith.constant 0 : index
    %c0_16 = arith.constant 0 : index
    %c0_17 = arith.constant 0 : index
    %24 = vector.load %arg5[%c0_15, %c0_16, %c0_17] : memref<1x1x8xi32, #tpu.memory_space<vmem>>, vector<1x1x8xi32>
    %25 = vector.shape_cast %24 : vector<1x1x8xi32> to vector<1x8xi32>
    %c256_i32 = arith.constant 256 : i32
    %26 = arith.muli %arg1, %c256_i32 : i32
    %27 = vector.broadcast %26 : i32 to vector<1x8xi32>
    %28 = arith.subi %23, %27 : vector<1x8xi32>
    %29 = tpu.iota {dimensions = array<i32: 0>} : vector<256x8xi32>
    %30 = vector.broadcast %28 : vector<1x8xi32> to vector<256x8xi32>
    %31 = arith.cmpi eq, %29, %30 : vector<256x8xi32>
    %32 = arith.extui %31 : vector<256x8xi1> to vector<256x8xi32>
    %33 = arith.sitofp %32 : vector<256x8xi32> to vector<256x8xf32>
    %cst_18 = arith.constant dense<0.000000e+00> : vector<4x8xf32>
    %34 = tpu.matmul %4, %33, %cst_18 {dimension_numbers = #tpu.dot_dimension_numbers<[1], [0], [0], [1], [0, 0, 1, 1], [], []>} : vector<4x256xf32>, vector<256x8xf32>, vector<4x8xf32> -> vector<4x8xf32>
    %35 = tpu.iota {dimensions = array<i32: 0>} : vector<4x8xi32>
    %36 = vector.broadcast %25 : vector<1x8xi32> to vector<4x8xi32>
    %37 = arith.cmpi eq, %35, %36 : vector<4x8xi32>
    %38 = arith.extui %37 : vector<4x8xi1> to vector<4x8xi32>
    %39 = arith.sitofp %38 : vector<4x8xi32> to vector<4x8xf32>
    %c0_19 = arith.constant 0 : index
    %c0_20 = arith.constant 0 : index
    %40 = vector.load %arg9[%c0_19, %c0_20] : memref<1x8xf32, #tpu.memory_space<vmem>>, vector<1x8xf32>
    %41 = arith.mulf %34, %39 : vector<4x8xf32>
    %cst_21 = arith.constant dense<0.000000e+00> : vector<8xf32>
    %42 = vector.multi_reduction <add>, %41, %cst_21 [0] : vector<4x8xf32> to vector<8xf32>
    %43 = vector.shape_cast %42 : vector<8xf32> to vector<1x8xf32>
    %44 = arith.addf %40, %43 : vector<1x8xf32>
    %c0_22 = arith.constant 0 : index
    %c0_23 = arith.constant 0 : index
    %45 = vector.load %arg9[%c0_22, %c0_23] : memref<1x8xf32, #tpu.memory_space<vmem>>, vector<1x8xf32>
    tpu.vector_store %arg9[%c0_22, %c0_23], %44 {strides = array<i32>} : memref<1x8xf32, #tpu.memory_space<vmem>>, vector<1x8xf32>,
    %c0_i32_24 = arith.constant 0 : i32
    %46 = arith.cmpi eq, %arg1, %c0_i32_24 : i32
    %47 = arith.extui %46 : i1 to i32
    %c0_i32_25 = arith.constant 0 : i32
    %48 = arith.cmpi ne, %47, %c0_i32_25 : i32
    scf.if %48 {
      %c0_26 = arith.constant 0 : index
      %c0_27 = arith.constant 0 : index
      %c0_28 = arith.constant 0 : index
      %49 = vector.load %arg6[%c0_26, %c0_27, %c0_28] : memref<1x1x8xf32, #tpu.memory_space<vmem>>, vector<1x1x8xf32>
      %50 = vector.shape_cast %49 : vector<1x1x8xf32> to vector<1x8xf32>
      %c0_29 = arith.constant 0 : index
      %c0_30 = arith.constant 0 : index
      %51 = vector.load %arg9[%c0_29, %c0_30] : memref<1x8xf32, #tpu.memory_space<vmem>>, vector<1x8xf32>
      %cst_31 = arith.constant 0.000000e+00 : f32
      %52 = vector.broadcast %cst_31 : f32 to vector<1x8xf32>
      %53 = arith.cmpf ogt, %50, %52 : vector<1x8xf32>
      %cst_32 = arith.constant 5.000000e-01 : f32
      %54 = vector.broadcast %cst_32 : f32 to vector<1x8xf32>
      %55 = arith.select %53, %51, %54 : vector<1x8xi1>, vector<1x8xf32>
      %cst_33 = arith.constant 1.000000e+00 : f32
      %56 = vector.broadcast %cst_33 : f32 to vector<1x8xf32>
      %57 = arith.subf %56, %55 : vector<1x8xf32>
      %58 = math.log %55 : vector<1x8xf32>
      %59 = arith.mulf %57, %57 : vector<1x8xf32>
      %60 = arith.mulf %58, %59 : vector<1x8xf32>
      %61 = arith.mulf %60, %50 : vector<1x8xf32>
      %62 = vector.shape_cast %61 : vector<1x8xf32> to vector<1x1x8xf32>
      %cst_34 = arith.constant dense<0.000000e+00> : vector<1xf32>
      %63 = vector.multi_reduction <add>, %62, %cst_34 [1, 2] : vector<1x1x8xf32> to vector<1xf32>
      %64 = vector.shape_cast %63 : vector<1xf32> to vector<1x1x1xf32>
      %65 = vector.extract %64[0, 0, 0] : f32 from vector<1x1x1xf32>
      %c0_35 = arith.constant 0 : index
      %c0_36 = arith.constant 0 : index
      %66 = vector.load %arg8[%c0_35, %c0_36] : memref<1x256xf32, #tpu.memory_space<vmem>>, vector<1x256xf32>
      %67 = vector.shape_cast %66 : vector<1x256xf32> to vector<1x1x256xf32>
      %cst_37 = arith.constant dense<0.000000e+00> : vector<1xf32>
      %68 = vector.multi_reduction <add>, %67, %cst_37 [1, 2] : vector<1x1x256xf32> to vector<1xf32>
      %69 = vector.shape_cast %68 : vector<1xf32> to vector<1x1x1xf32>
      %70 = vector.extract %69[0, 0, 0] : f32 from vector<1x1x1xf32>
      %71 = vector.shape_cast %50 : vector<1x8xf32> to vector<1x1x8xf32>
      %cst_38 = arith.constant dense<0.000000e+00> : vector<1xf32>
      %72 = vector.multi_reduction <add>, %71, %cst_38 [1, 2] : vector<1x1x8xf32> to vector<1xf32>
      %73 = vector.shape_cast %72 : vector<1xf32> to vector<1x1x1xf32>
      %74 = vector.extract %73[0, 0, 0] : f32 from vector<1x1x1xf32>
      %75 = tpu.iota {dimensions = array<i32: 1>} : vector<1x128xi32>
      %c0_i32_39 = arith.constant 0 : i32
      %76 = vector.broadcast %c0_i32_39 : i32 to vector<1x128xi32>
      %77 = arith.cmpi eq, %75, %76 : vector<1x128xi32>
      %cst_40 = arith.constant 0.000000e+00 : f32
      %78 = vector.broadcast %70 : f32 to vector<1x128xf32>
      %79 = vector.broadcast %cst_40 : f32 to vector<1x128xf32>
      %80 = arith.select %77, %78, %79 : vector<1x128xi1>, vector<1x128xf32>
      %c1_i32 = arith.constant 1 : i32
      %81 = vector.broadcast %c1_i32 : i32 to vector<1x128xi32>
      %82 = arith.cmpi eq, %75, %81 : vector<1x128xi32>
      %cst_41 = arith.constant 0.000000e+00 : f32
      %83 = vector.broadcast %65 : f32 to vector<1x128xf32>
      %84 = vector.broadcast %cst_41 : f32 to vector<1x128xf32>
      %85 = arith.select %82, %83, %84 : vector<1x128xi1>, vector<1x128xf32>
      %86 = arith.addf %80, %85 : vector<1x128xf32>
      %c2_i32 = arith.constant 2 : i32
      %87 = vector.broadcast %c2_i32 : i32 to vector<1x128xi32>
      %88 = arith.cmpi eq, %75, %87 : vector<1x128xi32>
      %cst_42 = arith.constant 0.000000e+00 : f32
      %89 = vector.broadcast %74 : f32 to vector<1x128xf32>
      %90 = vector.broadcast %cst_42 : f32 to vector<1x128xf32>
      %91 = arith.select %88, %89, %90 : vector<1x128xi1>, vector<1x128xf32>
      %92 = arith.addf %86, %91 : vector<1x128xf32>
      %c0_43 = arith.constant 0 : index
      %c0_44 = arith.constant 0 : index
      %c0_45 = arith.constant 0 : index
      %93 = vector.load %arg7[%c0_43, %c0_44, %c0_45] : memref<1x1x128xf32, #tpu.memory_space<vmem>>, vector<1x1x128xf32>
      %94 = vector.shape_cast %93 : vector<1x1x128xf32> to vector<1x128xf32>
      %95 = vector.shape_cast %92 : vector<1x128xf32> to vector<1x1x128xf32>
      tpu.vector_store %arg7[%c0_43, %c0_44, %c0_45], %95 {strides = array<i32>} : memref<1x1x128xf32, #tpu.memory_space<vmem>>, vector<1x1x128xf32>,
    } else {
    }
    return
  }
  func.func @transform_0(%arg0: i32, %arg1: i32) -> (i32, i32, i32) {
    %c0_i32 = arith.constant 0 : i32
    %c0_i32_0 = arith.constant 0 : i32
    return %arg0, %c0_i32, %arg1 : i32, i32, i32
  }
  func.func @transform_1(%arg0: i32, %arg1: i32) -> (i32, i32, i32) {
    %c0_i32 = arith.constant 0 : i32
    %c0_i32_0 = arith.constant 0 : i32
    return %arg0, %c0_i32, %arg1 : i32, i32, i32
  }
  func.func @transform_2(%arg0: i32, %arg1: i32) -> (i32, i32, i32) {
    %c0_i32 = arith.constant 0 : i32
    %c0_i32_0 = arith.constant 0 : i32
    %c0_i32_1 = arith.constant 0 : i32
    return %arg0, %c0_i32, %c0_i32_0 : i32, i32, i32
  }
  func.func @transform_3(%arg0: i32, %arg1: i32) -> (i32, i32, i32) {
    %c0_i32 = arith.constant 0 : i32
    %c0_i32_0 = arith.constant 0 : i32
    %c0_i32_1 = arith.constant 0 : i32
    return %arg0, %c0_i32, %c0_i32_0 : i32, i32, i32
  }
  func.func @transform_4(%arg0: i32, %arg1: i32) -> (i32, i32, i32) {
    %c0_i32 = arith.constant 0 : i32
    %c0_i32_0 = arith.constant 0 : i32
    %c0_i32_1 = arith.constant 0 : i32
    return %arg0, %c0_i32, %c0_i32_0 : i32, i32, i32
  }
  func.func @transform_5(%arg0: i32, %arg1: i32) -> (i32, i32, i32) {
    %c0_i32 = arith.constant 0 : i32
    %c0_i32_0 = arith.constant 0 : i32
    %c0_i32_1 = arith.constant 0 : i32
    return %arg0, %c0_i32, %c0_i32_0 : i32, i32, i32
  }
}

</mosaic_0001>

<bundles_post_ra>
// kernel: tpu_custom_call.1
= control target key start
LH: loop header
LB: loop body
LE: loop exit
PB: predicated region body
PF: predicated region fallthrough
CT: control target
= control target key end

     0   :  { %s1535_s0 = inlined_call_operand.hbm [shape: f32[2,4,256], index: 0, kind: input, shape index: {}]   ;;  %s1536_s1 = inlined_call_operand.hbm [shape: f32[2,4,256], index: 1, kind: input, shape index: {}]   ;;  %s1537_s2 = inlined_call_operand.vmem [shape: s32[2,1,8], index: 2, kind: input, shape index: {}]   ;;  %s1538_s3 = inlined_call_operand.vmem [shape: s32[2,1,8], index: 3, kind: input, shape index: {}]   ;;  %s1539_s4 = inlined_call_operand.vmem [shape: f32[2,1,8], index: 4, kind: input, shape index: {}]   ;;  %s1540_s5 = inlined_call_operand.hbm [shape: f32[2,1,128], index: 5, kind: output, shape index: {}]  }
   0x1   :  { %1541 = sst [smem:[#allocation13_spill]] %s1535_s0 }
   0x2   :  { %10 = vsyncpa [#allocation5], 0 }
   0x3   :  { %12 = vsyncpa [#allocation5 + $0x1], 0 }
   0x4   :  { %13 = vsyncpa [#allocation8], 0 }
   0x5   :  { %15 = vsyncpa [#allocation8 + $0x1], 0 }
   0x6   :  { %16 = vsyncpa [#allocation6], 0 }
   0x7   :  { %18 = vsyncpa [#allocation6 + $0x1], 0  ;;  %s1232_s18 = smov 0   ;;  %s1234_s19 = smov 0  }
   0x8   :  { %s1236_s20 = smov 0   ;;  %s1238_s21 = smov 0  }
   0x9   :  { %s1240_s22 = smov 0   ;;  %s1242_s23 = smov 0  }
   0xa LB: > { %s853_s24 = sadd.s32 4294967295, %s1194_s23   ;;  %s854_s25 = sadd.s32 4294967294, %s1194_s23   ;;  %s1194_s23 = sphi %s1242_s23, %s24_s23   ;;  %s1190_s22 = sphi %s1240_s22, %s1554_s22   ;;  %s1186_s21 = sphi %s1238_s21, %s1553_s21   ;;  %s1182_s20 = sphi %s1236_s20, %s1552_s20   ;;  %s1178_s19 = sphi %s1234_s19, %s1551_s19   ;;  %s1174_s18 = sphi %s1232_s18, %s1550_s18  }
   0xb   : > { %s36_s26 = sadd.s32 1, %s1190_s22  ;;  %s45_s27 = sadd.s32 1, %s1182_s20 }
   0xc   : > { %p38_p0 = scmp.ge.s32.totalorder %s36_s26, 2  ;;  %p52_p1 = scmp.ne.s32.totalorder %s1182_s20, %s1178_s19 }
   0xd   : > { %p53_p2 = scmp.eq.s32.totalorder %s1194_s23, 0  ;;  %p58_p3 = scmp.ne.s32.totalorder %s1178_s19, %s1174_s18 }
   0xe   : > { %s1556_s26 = smov (%p38_p0, %s36_s26), 0  ;;  %p59_p5 = scmp.eq.s32.totalorder %s853_s24, 0 }
   0xf   : > { %p1273_p4 = por %p53_p2, %p52_p1  ;;  %s40_s29 = ssub.s32 %s1190_s22, %s1556_s26 }
  0x10   : > { %p188_p6 = scmp.eq.s32.totalorder %s853_s24, 1  ;;  %p43_p7 = scmp.eq.s32.totalorder %s40_s29, 0 }
  0x11   : > { %p1279_p8 = por %p59_p5, %p58_p3  ;;  %p194_p10 = scmp.eq.s32.totalorder %s854_s25, 1 }
  0x12   : > { %p1283_p9 = por %p188_p6, %p52_p1  ;;  %p996_p13 = scmp.lt.s32.totalorder %s1194_s23, 2 }
  0x13   : > { %s1288_s7 = scalar_select %p43_p7, %s1182_s20, %s45_s27  }
  0x14   : > { %p1290_p11 = por %p194_p10, %p58_p3  ;;  %s1297_s9 = sand.u32 1, %s1182_s20  }
  0x15   : > { %s857_s10 = sshll.u32 %s1297_s9, 3  ;;  %s936_s11 = sshll.u32 %s1190_s22, 7 }
  0x16   : > { %s1546_s0 = sld [smem:[#allocation13_spill]]  ;;  %s218_s15 = scalar_lea.vmem [#allocation4], %s857_s10 }
  0x17   : > { %s228_s16 = sshll.u32 %s218_s15, 4  ;;  %p1306_p0 = pnand %p996_p13, %p1273_p4  ;;  %s229_s16 = int_to_ptr.vmem [resolvable:$true] %s228_s16 }
  0x18   : > { %p863_p1 = scmp.ge.s32.totalorder %s1194_s23, 1  ;;  %p272_p2 = scmp.lt.s32.totalorder %s1194_s23, 3 }
  0x19   : > { %s215_s24 = scalar_lea.sflag [#allocation5], %s1297_s9  ;;  %p1056_p3 = pneg %p1306_p0 }
  0x1a   : > { %s1067_s25 = scalar_lea.vmem %s229_s16, 128  ;;  %s1196_s27 = smov [#allocation4]  }
  0x1b   : > { %p1068_p5 = scmp.ne.s32.totalorder %s229_s16, %s1067_s25  ;;  %s1072_s29 = sshll.u32 %s1196_s27, 4  ;;  %s1073_s29 = int_to_ptr.vmem [resolvable:$false] %s1072_s29 }
  0x1c   : > { %s226_s14 = scalar_lea.hbm %s1546_s0, %s936_s11  ;;  %s1074_s28 = scalar_lea.vmem %s1073_s29, 256 }
  0x1d   : > { %p1070_p6 = pnand %p1068_p5, %p1056_p3  ;;  %p1075_p4 = scmp.lt.s32.totalorder %s229_s16, %s1073_s29 }
  0x1e   : > { %p1076_p10 = scmp.lt.s32.totalorder %s1074_s28, %s1067_s25 }
  0x1f   : > { %p1071_p7 = pneg %p1070_p6 }
  0x20   : > { %p1077_p13 = por %p1076_p10, %p1075_p4 }
  0x22   : > { %p1078_p12 = pnand %p1077_p13, %p1071_p7 }
  0x24   : > { %1081 = shalt.err (!%p1078_p12)
}
  0x25   : > { %988 = dma.hbm_to_vmem [thread:$0]  (!%p1306_p0), %s226_s14, 128, %s229_s16, %s215_s24  }
  0x26   : > { %p1324_p5 = pnand %p863_p1, %p272_p2  ;;  %s247_s25 = scalar_lea.hbm %s1536_s1, %s936_s11 }
  0x27   : > { %s239_s27 = scalar_lea.vmem [#allocation7], %s857_s10  ;;  %s236_s28 = scalar_lea.sflag [#allocation8], %s1297_s9 }
  0x28   : > { %s249_s29 = sshll.u32 %s239_s27, 4  ;;  %s1197_s14 = smov [#allocation7]   ;;  %s250_s29 = int_to_ptr.vmem [resolvable:$true] %s249_s29 }
  0x29   : > { %s1095_s0 = scalar_lea.vmem %s250_s29, 128  ;;  %s1100_s16 = sshll.u32 %s1197_s14, 4  ;;  %s1101_s16 = int_to_ptr.vmem [resolvable:$false] %s1100_s16 }
  0x2a   : > { %p1096_p12 = scmp.ne.s32.totalorder %s250_s29, %s1095_s0  ;;  %s1102_s24 = scalar_lea.vmem %s1101_s16, 256 }
  0x2b   : > { %p1103_p1 = scmp.lt.s32.totalorder %s250_s29, %s1101_s16  ;;  %p1104_p2 = scmp.lt.s32.totalorder %s1102_s24, %s1095_s0 }
  0x2c   : > { %p1098_p6 = pnand %p1096_p12, %p1056_p3 }
  0x2d   : > { %p1105_p4 = por %p1104_p2, %p1103_p1 }
  0x2e   : > { %p1099_p7 = pneg %p1098_p6 }
  0x30   : > { %p1106_p10 = pnand %p1105_p4, %p1099_p7 }
  0x32   : > { %1109 = shalt.err (!%p1106_p10)
}
  0x33   : > { %991 = dma.hbm_to_vmem [thread:$0]  (!%p1306_p0), %s247_s25, 128, %s250_s29, %s236_s28  }
  0x34   : > { %276 = sbr.rel (%p1324_p5) target bundleno = 566 (0x236), region = 40  ;;  %s1340_s9 = sand.u32 (!%p1324_p5), 1, %s1178_s19  }
  0x35   : > { %s864_s10 = sshll.u32 (!%p1324_p5), %s1340_s9, 3  ;;  %s279_s11 = scalar_lea.sflag (!%p1324_p5), [#allocation5], %s1340_s9 }
  0x36   : > { %s1344_s13 = scalar_lea.vmem (!%p1324_p5), [#allocation4], %s864_s10 }
  0x39   : > { %1161 = dma.done.wait (%p1279_p8), %s279_s11, 128  }
  0x3a   : > { %1163 = vsyncadd (%p1279_p8), %s279_s11, 4294967168  ;;  %s288_s0 = scalar_lea.sflag [#allocation8], %s1340_s9  ;;  %s1351_s17 = scalar_lea.vmem [#allocation7], %s864_s10 }
  0x3b   : > { %1165 = dma.done.wait (%p1279_p8), %s288_s0, 128  }
  0x3c   : > { %1167 = vsyncadd (%p1279_p8), %s288_s0, 4294967168  ;;  %p333_p0 = scmp.lt.s32.totalorder %s1186_s21, 1  ;;  %v346_v0 = vlaneseq  ;;  %v1198_v10 = vmov 1.0   ;;  %v1408_v20 = vld [vmem:[%s1344_s13] sm:$0xff]  ;;  %v354_v38 = vld [vmem:[%s1351_s17] sm:$0xff]  ;;  %s933_s0 = sshll.u32 %s1186_s21, 4 }
  0x3d   : > { %v546_v24 = vcombine.high %v1408_v20, %v1408_v20  ;;  %v358_v37 = vsub.f32 1.0, %v1408_v20  ;;  %v355_v39 = vsub.f32 1.0, %v354_v38  ;;  %v361_v43 = vmul.f32 %v1408_v20, %v1408_v20  ;;  %s330_s17 = scalar_lea.vmem [#allocation9], %s1340_s9  ;;  %s711_s30 = scalar_lea.sflag [#allocation6], %s1340_s9 }
  0x3e   : > { %s1359_s12 = scalar_select %p333_p0, %s1186_s21, 1  ;;  %v1362_v1 = vshrl.u32 %v346_v0, 7  ;;  %v1199_v60 = vmov 1966171168  }
  0x3f   : > { %612 = vmatprep.mubr.f32.mxu0 %v546_v24  ;;  %1050 = vlog2.f32 %v358_v37  ;;  %v356_v41 = vmul.f32 %v355_v39, %v355_v39  ;;  %v387_v61 = vunpack.c.l.s4 %v1199_v60 }
  0x40   : > { %s335_s27 = scalar_lea.vmem %s1537_s2, %s1359_s12  ;;  %v444_v2 = vadd.s32 248, %v1362_v1  ;;  %v428_v3 = vadd.s32 120, %v1362_v1  ;;  %v443_v4 = vadd.s32 240, %v1362_v1  ;;  %v427_v5 = vadd.s32 112, %v1362_v1  ;;  %s341_s28 = scalar_lea.vmem %s1539_s4, %s1359_s12 }
  0x41   : > { %v442_v6 = vadd.s32 232, %v1362_v1  ;;  %v1373_v7 = vld [vmem:[%s335_s27] ss:$0 sm:$0xff]  ;;  %v426_v8 = vadd.s32 104, %v1362_v1  ;;  %v441_v9 = vadd.s32 224, %v1362_v1  ;;  %v425_v11 = vadd.s32 96, %v1362_v1  ;;  %s338_s24 = scalar_lea.vmem %s1538_s3, %s1359_s12  ;;  %s721_s27 = scalar_lea.hbm %s1540_s5, %s933_s0 }
  0x42   : > { %vm480_vm0 = vcmp.eq.s32.totalorder %v444_v2, %v1373_v7  ;;  %vm464_vm1 = vcmp.eq.s32.totalorder %v428_v3, %v1373_v7  ;;  %vm479_vm2 = vcmp.eq.s32.totalorder %v443_v4, %v1373_v7  ;;  %vm463_vm3 = vcmp.eq.s32.totalorder %v427_v5, %v1373_v7  ;;  %s723_s12 = sshll.u32 %s330_s17, 4  ;;  %s724_s12 = int_to_ptr.vmem [resolvable:$true] %s723_s12 }
  0x43   : > { %938 = vmatprep.subr.msk.mxu0 %vm480_vm0, %v1198_v10  ;;  %vm478_vm4 = vcmp.eq.s32.totalorder %v442_v6, %v1373_v7  ;;  %v440_v12 = vadd.s32 216, %v1362_v1  ;;  %vm462_vm5 = vcmp.eq.s32.totalorder %v426_v8, %v1373_v7  ;;  %v424_v13 = vadd.s32 88, %v1362_v1  ;;  %s1110_s29 = scalar_lea.vmem %s724_s12, 16 }
  0x44   : > { %939 = vmatpush3.msk.msra.mxu0 %vm464_vm1, %v1198_v10  ;;  %vm477_vm6 = vcmp.eq.s32.totalorder %v441_v9, %v1373_v7  ;;  %v439_v14 = vadd.s32 208, %v1362_v1  ;;  %vm461_vm7 = vcmp.eq.s32.totalorder %v425_v11, %v1373_v7  ;;  %v423_v15 = vadd.s32 80, %v1362_v1  ;;  %p1111_p8 = scmp.ne.s32.totalorder %s724_s12, %s1110_s29 }
  0x45   : > { %940 = vmatprep.subr.msk.mxu0 %vm479_vm2, %v1198_v10  ;;  %vm476_vm8 = vcmp.eq.s32.totalorder %v440_v12, %v1373_v7  ;;  %v438_v16 = vadd.s32 200, %v1362_v1  ;;  %vm460_vm9 = vcmp.eq.s32.totalorder %v424_v13, %v1373_v7  ;;  %v422_v17 = vadd.s32 72, %v1362_v1  ;;  %v931_v12 = vld [vmem:[%s338_s24] ss:$0 sm:$0xff] }
  0x46   : > { %941 = vmatpush3.msk.msra.mxu0 %vm463_vm3, %v1198_v10  ;;  %vm475_vm10 = vcmp.eq.s32.totalorder %v439_v14, %v1373_v7  ;;  %v437_v18 = vadd.s32 192, %v1362_v1  ;;  %vm459_vm11 = vcmp.eq.s32.totalorder %v423_v15, %v1373_v7  ;;  %v421_v19 = vadd.s32 64, %v1362_v1  ;;  %p1112_p3 = pnand %p1111_p8, %p1283_p9 }
  0x47   : > { %942 = vmatprep.subr.msk.mxu0 %vm478_vm4, %v1198_v10  ;;  %vm474_vm12 = vcmp.eq.s32.totalorder %v438_v16, %v1373_v7  ;;  %v436_v21 = vadd.s32 184, %v1362_v1  ;;  %vm458_vm13 = vcmp.eq.s32.totalorder %v422_v17, %v1373_v7  ;;  %v420_v22 = vadd.s32 56, %v1362_v1 }
  0x48   : > { %943 = vmatpush3.msk.msra.mxu0 %vm462_vm5, %v1198_v10  ;;  %vm473_vm14 = vcmp.eq.s32.totalorder %v437_v18, %v1373_v7  ;;  %v435_v23 = vadd.s32 176, %v1362_v1  ;;  %vm457_vm15 = vcmp.eq.s32.totalorder %v421_v19, %v1373_v7  ;;  %v419_v25 = vadd.s32 48, %v1362_v1  ;;  %p1113_p13 = pneg %p1112_p3 }
  0x49   : > { %944 = vmatprep.subr.msk.mxu0 %vm477_vm6, %v1198_v10  ;;  %vm472_vm0 = vcmp.eq.s32.totalorder %v436_v21, %v1373_v7  ;;  %v434_v26 = vadd.s32 168, %v1362_v1  ;;  %vm456_vm1 = vcmp.eq.s32.totalorder %v420_v22, %v1373_v7  ;;  %v418_v27 = vadd.s32 40, %v1362_v1 }
  0x4a   : > { %945 = vmatpush3.msk.msra.mxu0 %vm461_vm7, %v1198_v10  ;;  %vm471_vm2 = vcmp.eq.s32.totalorder %v435_v23, %v1373_v7  ;;  %v433_v28 = vadd.s32 160, %v1362_v1  ;;  %vm455_vm3 = vcmp.eq.s32.totalorder %v419_v25, %v1373_v7  ;;  %v417_v29 = vadd.s32 32, %v1362_v1 }
  0x4b   : > { %946 = vmatprep.subr.msk.mxu0 %vm476_vm8, %v1198_v10  ;;  %vm470_vm4 = vcmp.eq.s32.totalorder %v434_v26, %v1373_v7  ;;  %v432_v30 = vadd.s32 152, %v1362_v1  ;;  %vm454_vm5 = vcmp.eq.s32.totalorder %v418_v27, %v1373_v7  ;;  %v416_v31 = vadd.s32 24, %v1362_v1 }
  0x4c   : > { %947 = vmatpush3.msk.msra.mxu0 %vm460_vm9, %v1198_v10  ;;  %vm469_vm6 = vcmp.eq.s32.totalorder %v433_v28, %v1373_v7  ;;  %v431_v32 = vadd.s32 144, %v1362_v1  ;;  %vm453_vm7 = vcmp.eq.s32.totalorder %v417_v29, %v1373_v7  ;;  %v415_v33 = vadd.s32 16, %v1362_v1  ;;  %v1051_v40 = vpop.eup %1050 }
  0x4d   : > { %948 = vmatprep.subr.msk.mxu0 %vm475_vm10, %v1198_v10  ;;  %vm468_vm8 = vcmp.eq.s32.totalorder %v432_v30, %v1373_v7  ;;  %v430_v34 = vadd.s32 136, %v1362_v1  ;;  %vm452_vm9 = vcmp.eq.s32.totalorder %v416_v31, %v1373_v7  ;;  %v414_v35 = vadd.s32 8, %v1362_v1 }
  0x4e   : > { %949 = vmatpush3.msk.msra.mxu0 %vm459_vm11, %v1198_v10  ;;  %vm467_vm10 = vcmp.eq.s32.totalorder %v431_v32, %v1373_v7  ;;  %v429_v36 = vadd.s32 128, %v1362_v1  ;;  %vm451_vm11 = vcmp.eq.s32.totalorder %v415_v33, %v1373_v7  ;;  %v360_v42 = vmul.f32 0.6931472, %v1051_v40 }
  0x4f   : > { %950 = vmatprep.subr.msk.mxu0 %vm474_vm12, %v1198_v10  ;;  %vm466_vm12 = vcmp.eq.s32.totalorder %v430_v34, %v1373_v7  ;;  %v357_v44 = vmul.f32 %v356_v41, %v356_v41  ;;  %v388_v2 = vunpack.c.0.s8 %v387_v61  ;;  %v1200_v6 = vmov 0.0  }
  0x50   : > { %951 = vmatpush3.msk.msra.mxu0 %vm458_vm13, %v1198_v10  ;;  %vm450_vm13 = vcmp.eq.s32.totalorder %v414_v35, %v1373_v7  ;;  %v362_v45 = vmul.f32 %v361_v43, %v360_v42  ;;  %v665_v30 = vsub.s32 0, %v1362_v1  ;;  %v669_v31 = vsub.s32 1, %v1362_v1 }
  0x51   : > { %952 = vmatprep.subr.msk.mxu0 %vm473_vm14, %v1198_v10  ;;  %vm465_vm14 = vcmp.eq.s32.totalorder %v429_v36, %v1373_v7  ;;  %v391_v4 = vsub.s32 %v388_v2, %v1362_v1  ;;  %v697_v2 = vand.u32 127, %v346_v0 }
  0x52   : > { %953 = vmatpush3.msk.msra.mxu0 %vm457_vm15, %v1198_v10  ;;  %vm449_vm15 = vcmp.eq.s32.totalorder %v1362_v1, %v1373_v7  ;;  %v363_v46 = vmul.f32 %v362_v45, %v357_v44 }
  0x53   : > { %954 = vmatprep.subr.msk.mxu0 %vm472_vm0, %v1198_v10  ;;  %vm368_vm0 = vcmask 1043456  }
  0x54   : > { %955 = vmatpush3.msk.msra.mxu0 %vm456_vm1, %v1198_v10  ;;  %v366_v47 = vcombine.high %v363_v46, %v363_v46  ;;  %v369_v48 = vsel %vm368_vm0, %v363_v46, 0.0  ;;  %vm348_vm1 = vcmp.lt.s32.totalorder %v346_v0, 256 }
  0x55   : > { %956 = vmatprep.subr.msk.mxu0 %vm471_vm2, %v1198_v10  ;;  %v370_v50 = vrot.slane %v369_v48, 4  ;;  %350 = vst.msk [vmem:[#allocation2] sm:$0x3] %vm348_vm1, %v1200_v6  ;;  %vm351_vm2 = vcmask 57344  }
  0x56   : > { %957 = vmatpush3.msk.msra.mxu0 %vm455_vm3, %v1198_v10  ;;  %v376_v49 = vsel %vm368_vm0, %v366_v47, 0.0  ;;  %352 = vst.msk [vmem:[#allocation3] sm:$0x1] %vm351_vm2, %v1200_v6  ;;  %vm622_vm3 = vcmp.eq.s32.totalorder %v1362_v1, %v931_v12 }
  0x57   : > { %958 = vmatprep.subr.msk.mxu0 %vm470_vm4, %v1198_v10  ;;  %v377_v51 = vrot.slane %v376_v49, 4  ;;  %v371_v52 = vadd.f32 %v370_v50, %v369_v48  ;;  %v932_v15 = vsel %vm622_vm3, 1.0, %v1200_v6  ;;  %vm627_vm4 = vcmask 60416  }
  0x58   : > { %959 = vmatpush3.msk.msra.mxu0 %vm454_vm5, %v1198_v10 }
  0x59   : > { %960 = vmatprep.subr.msk.mxu0 %vm469_vm6, %v1198_v10  ;;  %v378_v53 = vadd.f32 %v377_v51, %v376_v49  ;;  %v372_v54 = vrot.slane %v371_v52, 2  ;;  %vm673_vm6 = vcmask 1040384  }
  0x5a   : > { %961 = vmatpush3.msk.msra.mxu0 %vm453_vm7, %v1198_v10  ;;  %vm701_vm7 = vcmp.eq.s32.totalorder %v697_v2, 1 }
  0x5b   : > { %962 = vmatprep.subr.msk.mxu0 %vm468_vm8, %v1198_v10  ;;  %v379_v55 = vrot.slane %v378_v53, 2  ;;  %v373_v56 = vadd.f32 %v372_v54, %v371_v52  ;;  %vm698_vm8 = vcmp.eq.s32.totalorder %v697_v2, 0 }
  0x5c   : > { %963 = vmatpush3.msk.msra.mxu0 %vm452_vm9, %v1198_v10  ;;  %v364_v8 = vld [vmem:[#allocation2] sm:$0x3]  ;;  %vm705_vm9 = vcmp.eq.s32.totalorder %v697_v2, 2 }
  0x5d   : > { %964 = vmatprep.subr.msk.mxu0 %vm467_vm10, %v1198_v10  ;;  %v380_v57 = vadd.f32 %v379_v55, %v378_v53  ;;  %v374_v58 = vrot.slane %v373_v56, 1  ;;  %v625_v24 = vld [vmem:[#allocation3] sm:$0x1] }
  0x5e   : > { %965 = vmatpush3.msk.msra.mxu0 %vm451_vm11, %v1198_v10 }
  0x5f   : > { %966 = vmatprep.subr.msk.mxu0 %vm466_vm12, %v1198_v10  ;;  %v381_v59 = vrot.slane %v380_v57, 1  ;;  %v375_v62 = vadd.f32 %v374_v58, %v373_v56 }
  0x60   : > { %967 = vmatpush3.msk.msra.mxu0 %vm450_vm13, %v1198_v10 }
  0x61   : > { %968 = vmatprep.subr.msk.mxu0 %vm465_vm14, %v1198_v10  ;;  %v382_v63 = vadd.f32 %v381_v59, %v380_v57 }
  0x62   : > { %969 = vmatpush3.msk.msra.mxu0 %vm449_vm15, %v1198_v10  ;;  %v641_v10 = vld [vmem:[%s341_s28] sm:$0x1]  ;;  %s1201_s28 = smov [#allocation9]  }
  0x63   : > { %613 = vmatmul.mubr.f32.vlgmr.msra.gmra.mxu0 %v1408_v20  ;;  %v385_v3 = vcombine.low %v375_v62, %v382_v63  ;;  %v686_v11 = vsel %vm351_vm2, %v641_v10, 0.0  ;;  %vm643_vm5 = vcmp.gt.f32.partialorder %v641_v10, 0.0  ;;  %s1114_s14 = sshll.u32 %s1201_s28, 4  ;;  %s1115_s14 = int_to_ptr.vmem [resolvable:$false] %s1114_s14 }
  0x64   : > { %687 = vadd.xlane.f32.xlu1 %v686_v11  ;;  %s1116_s21 = scalar_lea.vmem %s1115_s14, 32  ;;  %p1117_p5 = scmp.lt.s32.totalorder %s724_s12, %s1115_s14 }
  0x65   : > { %v392_v5 = vrot.slane %v385_v3, %v391_v4  ;;  %p1118_p12 = scmp.lt.s32.totalorder %s1116_s21, %s1110_s29 }
  0x67   : > { %v399_v7 = vrot.slane %v392_v5, %v391_v4  ;;  %p1119_p6 = por %p1118_p12, %p1117_p5 }
  0x69   : > { %v401_v9 = vadd.f32 %v399_v7, %v364_v8  ;;  %p1120_p7 = pnand %p1119_p6, %p1113_p13 }
  0x6b   : > { %406 = vst.msk [vmem:[#allocation2] sm:$0x3] %vm348_vm1, %v401_v9 }
  0x72   : > { %v661_v32 = vld [vmem:[#allocation2] sm:$0x3] }
  0x73   : > { %v666_v36 = vrot.slane %v661_v32, %v665_v30  ;;  %v670_v37 = vrot.slane %v661_v32, %v669_v31 }
  0x75   : > { %v674_v40 = vsel %vm673_vm6, %v666_v36, 0.0  ;;  %v675_v41 = vsel %vm673_vm6, %v670_v37, 0.0 }
  0x76   : > { %v676_v43 = vadd.f32 %v675_v41, %v674_v40 }
  0xed   : > { %v688_v44 = vpop.xlane.xlu1 %687 }
  0xee   : > { %v689_v45 = vrot.slane %v688_v44, 4 }
  0xf0   : > { %v690_v46 = vadd.f32 %v689_v45, %v688_v44 }
  0xf2   : > { %v691_v49 = vrot.slane %v690_v46, 2 }
  0xf4   : > { %v692_v55 = vadd.f32 %v691_v49, %v690_v46 }
  0xf6   : > { %v693_v60 = vrot.slane %v692_v55, 1 }
  0xf8   : > { %v694_v63 = vadd.f32 %v693_v60, %v692_v55 }
 0x123   : > { %v970_v13 = vpop.f32.mrf.mxu0 }
 0x125   : > { %v971_v14 = vpop.f32.mrf.mxu0 }
 0x126   : > { %v972_v16 = vadd.f32 %v971_v14, %v970_v13 }
 0x128   : > { %v626_v17 = vmul.f32 %v972_v16, %v932_v15 }
 0x12a   : > { %v628_v18 = vsel %vm627_vm4, %v626_v17, 0.0 }
 0x12b   : > { %v629_v19 = vrot.slane %v628_v18, 4 }
 0x12d   : > { %v630_v20 = vadd.f32 %v629_v19, %v628_v18 }
 0x12f   : > { %v631_v21 = vrot.slane %v630_v20, 2 }
 0x131   : > { %v632_v22 = vadd.f32 %v631_v21, %v630_v20 }
 0x133   : > { %v633_v23 = vrot.slane %v632_v22, 1 }
 0x135   : > { %v634_v25 = vadd.f32 %v633_v23, %v632_v22 }
 0x137   : > { %v635_v26 = vadd.f32 %v634_v25, %v625_v24 }
 0x139   : > { %637 = vst.msk [vmem:[#allocation3] sm:$0x1] %vm351_vm2, %v635_v26 }
 0x140   : > { %v642_v27 = vld [vmem:[#allocation3] sm:$0x1] }
 0x141   : > { %v644_v28 = vsel %vm643_vm5, %v642_v27, 0.5 }
 0x142   : > { %1052 = vlog2.f32 %v644_v28  ;;  %v645_v29 = vsub.f32 1.0, %v644_v28 }
 0x144   : > { %v648_v35 = vmul.f32 %v645_v29, %v645_v29 }
 0x14f   : > { %v1053_v33 = vpop.eup %1052 }
 0x150   : > { %v647_v34 = vmul.f32 0.6931472, %v1053_v33 }
 0x152   : > { %v649_v38 = vmul.f32 %v648_v35, %v647_v34 }
 0x154   : > { %v650_v39 = vmul.f32 %v649_v38, %v641_v10 }
 0x156   : > { %v651_v42 = vsel %vm351_vm2, %v650_v39, 0.0 }
 0x157   : > { %652 = vadd.xlane.f32.xlu0 %v651_v42 }
 0x15b   : > { %677 = vadd.xlane.f32.xlu0 %v676_v43 }
 0x1e0   : > { %v653_v1 = vpop.xlane.xlu0 %652 }
 0x1e1   : > { %v654_v47 = vrot.slane %v653_v1, 4 }
 0x1e3   : > { %v655_v48 = vadd.f32 %v654_v47, %v653_v1 }
 0x1e4   : > { %v678_v50 = vpop.xlane.xlu0 %677 }
 0x1e5   : > { %v656_v51 = vrot.slane %v655_v48, 2  ;;  %v679_v52 = vrot.slane %v678_v50, 4 }
 0x1e7   : > { %v680_v53 = vadd.f32 %v679_v52, %v678_v50  ;;  %v657_v54 = vadd.f32 %v656_v51, %v655_v48 }
 0x1e9   : > { %v681_v56 = vrot.slane %v680_v53, 2  ;;  %v658_v57 = vrot.slane %v657_v54, 1 }
 0x1eb   : > { %v682_v58 = vadd.f32 %v681_v56, %v680_v53  ;;  %v659_v59 = vadd.f32 %v658_v57, %v657_v54 }
 0x1ed   : > { %973 = vpush %v659_v59  ;;  %v683_v61 = vrot.slane %v682_v58, 1 }
 0x1ef   : > { %v684_v62 = vadd.f32 %v683_v61, %v682_v58 }
 0x1f1   : > { %975 = vpush %v684_v62 }
 0x1f2   : > { %977 = vpush %v694_v63 }
 0x21e   : > { %s974_s10 = spop %973 }
 0x21f   : > { %v702_v3 = vstv %s974_s10 }
 0x220   : > { %v703_v5 = vsel %vm701_vm7, %v702_v3, 0.0 }
 0x222   : > { %s976_s11 = spop %975 }
 0x223   : > { %v699_v4 = vstv %s976_s11  ;;  %s978_s13 = spop %977 }
 0x224   : > { %v700_v6 = vsel %vm698_vm8, %v699_v4, 0.0  ;;  %v706_v7 = vstv %s978_s13 }
 0x225   : > { %v704_v8 = vadd.f32 %v703_v5, %v700_v6  ;;  %v707_v9 = vsel %vm705_vm9, %v706_v7, 0.0 }
 0x227   : > { %v708_v10 = vadd.f32 %v707_v9, %v704_v8 }
 0x229   : > { %709 = vst [vmem:[%s330_s17] sm:$0x1] %v708_v10 }
 0x22a   : > { %1123 = shalt.err (!%p1120_p7)
}
 0x22b   : > { %s1124_s16 = scalar_lea.hbm %s721_s27, 16  ;;  %s1128_s10 = scalar_lea.hbm %s1540_s5, 32 }
 0x22c   : > { %p1125_p1 = scmp.ne.s32.totalorder %s721_s27, %s1124_s16  ;;  %p1129_p10 = scmp.lt.s32.totalorder %s721_s27, %s1540_s5 }
 0x22d   : > { %p1130_p0 = scmp.lt.s32.totalorder %s1128_s10, %s1124_s16 }
 0x22e   : > { %p1126_p2 = pnand %p1125_p1, %p1283_p9 }
 0x22f   : > { %p1131_p8 = por %p1130_p0, %p1129_p10 }
 0x230   : > { %p1127_p4 = pneg %p1126_p2 }
 0x232   : > { %p1132_p3 = pnand %p1131_p8, %p1127_p4 }
 0x234   : > { %1135 = shalt.err (!%p1132_p3)
}
 0x235   : > { %983 = dma.vmem_to_hbm [thread:$0]  (%p1283_p9), %s724_s12, 16, %s721_s27, %s711_s30  }
 0x236 PF: > { %s735_s0 = sand.u32 1, %s1174_s18   ;;  %p1549_p13 = scmp.ge.s32.totalorder %s1194_s23, 2 }
 0x237   : > { %s736_s17 = scalar_lea.sflag [#allocation6], %s735_s0 }
 0x238   : > { %p993_p5 = pnand %p1549_p13, %p1290_p11 }
 0x23a   : > { %p994_p12 = pneg %p993_p5 }
 0x23c   : > { %1169 = dma.done.wait (%p994_p12), %s736_s17, 16  }
 0x23d   : > { %1171 = vsyncadd (%p994_p12), %s736_s17, 4294967280  ;;  %s24_s23 = sadd.s32 1, %s1194_s23   ;;  %s1550_s18 = smov %s1178_s19 }
 0x23e   : > { %p21_p6 = scmp.ge.s32.totalorder %s24_s23, 4   ;;  %s1551_s19 = smov %s1182_s20 }
 0x23f   : > { %s1552_s20 = smov %s1288_s7  ;;  %s1553_s21 = smov %s1190_s22 }
 0x240   : > { %s1554_s22 = smov %s1556_s26  ;;  %23 = sbr.rel (!%p21_p6) target bundleno = 10 (0xa), region = 115 }
 0x245   :  { %740 = vsyncpa [#allocation5], 1 }
 0x246   :  { %742 = vsyncpa [#allocation5 + $0x1], 1 }
 0x247   :  { %743 = vsyncpa [#allocation8], 1 }
 0x248   :  { %745 = vsyncpa [#allocation8 + $0x1], 1 }
 0x249   :  { %746 = vsyncpa [#allocation6], 1 }
 0x24a   :  { %748 = vsyncpa [#allocation6 + $0x1], 1 }

</bundles_post_ra>
